<compile_context>
chip_gen: v7x
topology: tpu7x:2x2x1
jax: 0.10.0
libtpu: 0.0.40
codegen_flags: <defaults>
</compile_context>

<pallas_src>
import jax
import jax.numpy as jnp
from jax.experimental import pallas as pl
from jax.experimental.pallas import tpu as pltpu

SHRINK = 16.0
_LANE_CANDIDATES = (512, 256, 128)   # lane-dense last dims (multiples of 128)


def _device_kind():
    try:
        return (jax.devices()[0].device_kind or "").lower()
    except Exception:
        return ""


def _make_kernel(block_rows, lane_w, k_seq, num_blocks, tail_rows, needs_tail_mask):
    """Builds the focal-loss partial-sum kernel for static tiling params."""

    def _accumulate(pred, gt, pos_ref, neg_ref, npos_ref):
        one_m_pred = 1.0 - pred
        pos_inds = (gt == 1.0).astype(jnp.float32)
        # neg_inds kept (not folded into (1-gt)^4) so semantics match the
        # reference for arbitrary gt and masked/padded elements (gt=2.0) vanish.
        neg_inds = (gt < 1.0).astype(jnp.float32)

        omg = 1.0 - gt
        omg2 = omg * omg
        neg_weights = omg2 * omg2                     # (1 - gt) ** 4

        pos_loss = jnp.log(pred) * (one_m_pred * one_m_pred) * pos_inds
        # '/ shrink' hoisted: applied once to the accumulated sum in the wrapper.
        neg_loss = jnp.log(one_m_pred) * (pred * pred) * neg_weights * neg_inds

        sub = block_rows // 8
        # Pure-VPU accumulation into vreg-shaped (8, lane_w) partials; the
        # cross-lane/sublane reduction to a scalar happens once, outside.
        pos_ref[...] += jnp.sum(pos_loss.reshape(sub, 8, lane_w), axis=0)
        neg_ref[...] += jnp.sum(neg_loss.reshape(sub, 8, lane_w), axis=0)
        npos_ref[...] += jnp.sum(pos_inds.reshape(sub, 8, lane_w), axis=0)

    def kernel(pred_ref, gt_ref, pos_ref, neg_ref, npos_ref):
        k = pl.program_id(1)

        @pl.when(k == 0)
        def _init():
            pos_ref[...] = jnp.zeros_like(pos_ref)
            neg_ref[...] = jnp.zeros_like(neg_ref)
            npos_ref[...] = jnp.zeros_like(npos_ref)

        if not needs_tail_mask:
            _accumulate(pred_ref[...].astype(jnp.float32),
                        gt_ref[...].astype(jnp.float32),
                        pos_ref, neg_ref, npos_ref)
        else:
            blk = pl.program_id(0) * k_seq + k
            is_tail = blk == (num_blocks - 1)

            @pl.when(jnp.logical_not(is_tail))
            def _full_block():
                _accumulate(pred_ref[...].astype(jnp.float32),
                            gt_ref[...].astype(jnp.float32),
                            pos_ref, neg_ref, npos_ref)

            @pl.when(is_tail)
            def _tail_block():
                # Only the final (partial) block pays for the row mask. Rows
                # past the real data get neutral values (pred=0.5, gt=2.0) so
                # they contribute exactly zero and all logs stay finite.
                row = jax.lax.broadcasted_iota(jnp.int32, (block_rows, lane_w), 0)
                valid = row < tail_rows
                pred = jnp.where(valid, pred_ref[...].astype(jnp.float32), 0.5)
                gt = jnp.where(valid, gt_ref[...].astype(jnp.float32), 2.0)
                _accumulate(pred, gt, pos_ref, neg_ref, npos_ref)

    return kernel


def focal_loss(pred, gt, shrink=SHRINK):
    """CornerNet-style focal loss. pred, gt: (B, C, H, W). Returns scalar f32."""
    n = pred.size
    assert gt.shape == pred.shape

    kind = _device_kind()
    is_v7 = "v7" in kind
    # v7x: larger tiles to amortize the ~0.35us/step overhead (HBM @ 3.2 TB/s).
    # v5e/v6e: 1024x512 f32 is already ~HBM roofline and fits v5e's 16 MiB
    # scoped-VMEM default with double buffering.
    max_block_rows = 2048 if is_v7 else 1024

    # ---- Lane-dense (rows, lane_w) layout, zero-copy whenever possible. ----
    # Prefer a lane width that (a) divides n (pure reshape, no pad/copy) and
    # (b) yields rows % 8 == 0 (no tail mask needed at all).
    lane_w = None
    for cand in _LANE_CANDIDATES:
        if n % cand == 0 and (n // cand) % 8 == 0:
            lane_w = cand
            break
    if lane_w is None:
        for cand in _LANE_CANDIDATES:
            if n % cand == 0:
                lane_w = cand
                break

    if lane_w is not None:
        rows_total = n // lane_w
        pred2d = pred.reshape(rows_total, lane_w)        # zero-copy reshape
        gt2d = gt.reshape(rows_total, lane_w)
    else:
        # TODO(synk): truly ragged n (not a multiple of 128) still needs one
        # small pad-copy up to the next 128-lane boundary; neutral pad values
        # (pred=0.5, gt=2.0) contribute exactly zero.
        lane_w = 128
        rows_total = -(-n // lane_w)
        padded_n = rows_total * lane_w
        pred2d = jnp.pad(pred.reshape(-1), (0, padded_n - n),
                         constant_values=0.5).reshape(rows_total, lane_w)
        gt2d = jnp.pad(gt.reshape(-1), (0, padded_n - n),
                       constant_values=2.0).reshape(rows_total, lane_w)

    if rows_total < 8:
        # Tiny inputs: pad the row dim to one full (8, lane_w) tile (cheap).
        pred2d = jnp.pad(pred2d, ((0, 8 - rows_total), (0, 0)), constant_values=0.5)
        gt2d = jnp.pad(gt2d, ((0, 8 - rows_total), (0, 0)), constant_values=2.0)
        rows_total = 8

    block_rows = min(max_block_rows, (rows_total // 8) * 8)   # multiple of 8
    num_blocks = -(-rows_total // block_rows)
    needs_tail_mask = num_blocks * block_rows != rows_total
    tail_rows = rows_total - (num_blocks - 1) * block_rows

    # Two-TensorCore split only where it exists (v7x). Require an even split
    # so no grid block is fully out of bounds.
    p_par = 2 if (is_v7 and num_blocks >= 2 and num_blocks % 2 == 0) else 1
    k_seq = num_blocks // p_par

    kernel = _make_kernel(block_rows, lane_w, k_seq, num_blocks,
                          tail_rows, needs_tail_mask)

    part_shape = jax.ShapeDtypeStruct((p_par * 8, lane_w), jnp.float32)
    in_map = lambda p, k: (p * k_seq + k, 0)
    out_map = lambda p, k: (p, 0)

    in_bytes = (pred2d.size * pred2d.dtype.itemsize
                + gt2d.size * gt2d.dtype.itemsize)
    cost = pl.CostEstimate(flops=18 * n, transcendentals=2 * n,
                           bytes_accessed=int(in_bytes))

    pos_part, neg_part, npos_part = pl.pallas_call(
        kernel,
        out_shape=(part_shape, part_shape, part_shape),
        grid_spec=pltpu.PrefetchScalarGridSpec(
            num_scalar_prefetch=0,
            grid=(p_par, k_seq),
            in_specs=[
                pl.BlockSpec((block_rows, lane_w), in_map),
                pl.BlockSpec((block_rows, lane_w), in_map),
            ],
            out_specs=[
                pl.BlockSpec((8, lane_w), out_map),
                pl.BlockSpec((8, lane_w), out_map),
                pl.BlockSpec((8, lane_w), out_map),
            ],
        ),
        compiler_params=pltpu.CompilerParams(
            dimension_semantics=("parallel", "arbitrary"),
            vmem_limit_bytes=(40 << 20) if block_rows > 1024 else None,
        ),
        cost_estimate=cost,
    )(pred2d, gt2d)

    # Tiny final reductions + data-dependent branch done in plain JAX.
    pos_s = jnp.sum(pos_part)
    neg_s = jnp.sum(neg_part) / shrink
    num_pos = jnp.sum(npos_part)
    return jnp.where(num_pos == 0.0, -neg_s, -(pos_s + neg_s) / num_pos)


def focal_loss_ref(pred, gt, shrink=SHRINK):
    """Pure-JAX reference matching the PyTorch _neg_loss exactly."""
    pred = pred.astype(jnp.float32)
    gt = gt.astype(jnp.float32)
    pos_inds = (gt == 1.0).astype(jnp.float32)
    neg_inds = (gt < 1.0).astype(jnp.float32)
    neg_weights = (1.0 - gt) ** 4
    pos_loss = jnp.sum(jnp.log(pred) * (1.0 - pred) ** 2 * pos_inds)
    neg_loss = jnp.sum(jnp.log(1.0 - pred) * pred ** 2 * neg_weights * neg_inds / shrink)
    num_pos = jnp.sum(pos_inds)
    return jnp.where(num_pos == 0.0, -neg_loss, -(pos_loss + neg_loss) / num_pos)


if __name__ == "__main__":
    key = jax.random.PRNGKey(0)
    k_pred, k_gt, k_pos = jax.random.split(key, 3)

    B, C, H, W = 2, 4, 16, 16

    # pred in (0, 1), bounded away from endpoints to keep log() finite.
    pred = jax.nn.sigmoid(jax.random.normal(k_pred, (B, C, H, W), jnp.float32))
    pred = jnp.clip(pred, 1e-4, 1.0 - 1e-4)

    # Gaussian-like heatmap target in [0, 1] with some exact 1.0 peaks.
    gt = jax.random.uniform(k_gt, (B, C, H, W), jnp.float32)
    peak_mask = jax.random.uniform(k_pos, (B, C, H, W)) < 0.01
    gt = jnp.where(peak_mask, 1.0, gt * 0.99)

    loss = jax.block_until_ready(focal_loss(pred, gt))
    ref = jax.block_until_ready(focal_loss_ref(pred, gt))
    assert jnp.allclose(loss, ref, rtol=1e-5, atol=1e-5), (loss, ref)

    # Also exercise a ragged row count (partial tail block path).
    pred_b = jnp.clip(
        jax.nn.sigmoid(jax.random.normal(k_pred, (1, 3, 24, 40), jnp.float32)),
        1e-4, 1.0 - 1e-4)
    gt_b = jax.random.uniform(k_gt, (1, 3, 24, 40), jnp.float32) * 0.99
    gt_b = gt_b.at[0, 0, 5, 7].set(1.0)
    loss_b = jax.block_until_ready(focal_loss(pred_b, gt_b))
    ref_b = jax.block_until_ready(focal_loss_ref(pred_b, gt_b))
    assert jnp.allclose(loss_b, ref_b, rtol=1e-5, atol=1e-5), (loss_b, ref_b)

    print("KERNEL_OK")
</pallas_src>

<mosaic_0001>
module attributes {stable_mosaic.version = 11 : i64} {
  func.func @kernel(%arg0: i32, %arg1: i32, %arg2: memref<8x256xf32, #tpu.memory_space<vmem>>, %arg3: memref<8x256xf32, #tpu.memory_space<vmem>>, %arg4: memref<8x256xf32, #tpu.memory_space<vmem>>, %arg5: memref<8x256xf32, #tpu.memory_space<vmem>>, %arg6: memref<8x256xf32, #tpu.memory_space<vmem>>) attributes {dimension_semantics = [#tpu.dimension_semantics<parallel>, #tpu.dimension_semantics<arbitrary>], iteration_bounds = array<i64: 1, 1>, scalar_prefetch = 0 : i64, scratch_operands = 0 : i64, tpu.core_type = #tpu.core_type<tc>, window_params = [{transform_indices = @transform_0, window_bounds = array<i64: 8, 256>}, {transform_indices = @transform_1, window_bounds = array<i64: 8, 256>}, {transform_indices = @transform_2, window_bounds = array<i64: 8, 256>}, {transform_indices = @transform_3, window_bounds = array<i64: 8, 256>}, {transform_indices = @transform_4, window_bounds = array<i64: 8, 256>}]} {
    %c0_i32 = arith.constant 0 : i32
    %0 = arith.cmpi eq, %arg1, %c0_i32 : i32
    %1 = arith.extui %0 : i1 to i32
    %c0_i32_0 = arith.constant 0 : i32
    %2 = arith.cmpi ne, %1, %c0_i32_0 : i32
    scf.if %2 {
      %cst_22 = arith.constant 0.000000e+00 : f32
      %43 = vector.broadcast %cst_22 : f32 to vector<8x256xf32>
      %c0_23 = arith.constant 0 : index
      %c0_24 = arith.constant 0 : index
      %44 = vector.load %arg4[%c0_23, %c0_24] : memref<8x256xf32, #tpu.memory_space<vmem>>, vector<8x256xf32>
      tpu.vector_store %arg4[%c0_23, %c0_24], %43 {strides = array<i32>} : memref<8x256xf32, #tpu.memory_space<vmem>>, vector<8x256xf32>,
      %cst_25 = arith.constant 0.000000e+00 : f32
      %45 = vector.broadcast %cst_25 : f32 to vector<8x256xf32>
      %c0_26 = arith.constant 0 : index
      %c0_27 = arith.constant 0 : index
      %46 = vector.load %arg5[%c0_26, %c0_27] : memref<8x256xf32, #tpu.memory_space<vmem>>, vector<8x256xf32>
      tpu.vector_store %arg5[%c0_26, %c0_27], %45 {strides = array<i32>} : memref<8x256xf32, #tpu.memory_space<vmem>>, vector<8x256xf32>,
      %cst_28 = arith.constant 0.000000e+00 : f32
      %47 = vector.broadcast %cst_28 : f32 to vector<8x256xf32>
      %c0_29 = arith.constant 0 : index
      %c0_30 = arith.constant 0 : index
      %48 = vector.load %arg6[%c0_29, %c0_30] : memref<8x256xf32, #tpu.memory_space<vmem>>, vector<8x256xf32>
      tpu.vector_store %arg6[%c0_29, %c0_30], %47 {strides = array<i32>} : memref<8x256xf32, #tpu.memory_space<vmem>>, vector<8x256xf32>,
    } else {
    }
    %c0 = arith.constant 0 : index
    %c0_1 = arith.constant 0 : index
    %3 = vector.load %arg2[%c0, %c0_1] : memref<8x256xf32, #tpu.memory_space<vmem>>, vector<8x256xf32>
    %c0_2 = arith.constant 0 : index
    %c0_3 = arith.constant 0 : index
    %4 = vector.load %arg3[%c0_2, %c0_3] : memref<8x256xf32, #tpu.memory_space<vmem>>, vector<8x256xf32>
    %cst = arith.constant 1.000000e+00 : f32
    %5 = vector.broadcast %cst : f32 to vector<8x256xf32>
    %6 = arith.subf %5, %3 : vector<8x256xf32>
    %cst_4 = arith.constant 1.000000e+00 : f32
    %7 = vector.broadcast %cst_4 : f32 to vector<8x256xf32>
    %8 = arith.cmpf oeq, %4, %7 : vector<8x256xf32>
    %9 = arith.extui %8 : vector<8x256xi1> to vector<8x256xi32>
    %10 = arith.sitofp %9 : vector<8x256xi32> to vector<8x256xf32>
    %cst_5 = arith.constant 1.000000e+00 : f32
    %11 = vector.broadcast %cst_5 : f32 to vector<8x256xf32>
    %12 = arith.cmpf olt, %4, %11 : vector<8x256xf32>
    %13 = arith.extui %12 : vector<8x256xi1> to vector<8x256xi32>
    %14 = arith.sitofp %13 : vector<8x256xi32> to vector<8x256xf32>
    %cst_6 = arith.constant 1.000000e+00 : f32
    %15 = vector.broadcast %cst_6 : f32 to vector<8x256xf32>
    %16 = arith.subf %15, %4 : vector<8x256xf32>
    %17 = arith.mulf %16, %16 : vector<8x256xf32>
    %18 = arith.mulf %17, %17 : vector<8x256xf32>
    %19 = math.log %3 : vector<8x256xf32>
    %20 = arith.mulf %6, %6 : vector<8x256xf32>
    %21 = arith.mulf %19, %20 : vector<8x256xf32>
    %22 = arith.mulf %21, %10 : vector<8x256xf32>
    %23 = math.log %6 : vector<8x256xf32>
    %24 = arith.mulf %3, %3 : vector<8x256xf32>
    %25 = arith.mulf %23, %24 : vector<8x256xf32>
    %26 = arith.mulf %25, %18 : vector<8x256xf32>
    %27 = arith.mulf %26, %14 : vector<8x256xf32>
    %c0_7 = arith.constant 0 : index
    %c0_8 = arith.constant 0 : index
    %28 = vector.load %arg4[%c0_7, %c0_8] : memref<8x256xf32, #tpu.memory_space<vmem>>, vector<8x256xf32>
    %29 = vector.shape_cast %22 : vector<8x256xf32> to vector<1x8x256xf32>
    %cst_9 = arith.constant dense<0.000000e+00> : vector<8x256xf32>
    %30 = vector.multi_reduction <add>, %29, %cst_9 [0] : vector<1x8x256xf32> to vector<8x256xf32>
    %31 = arith.addf %28, %30 : vector<8x256xf32>
    %c0_10 = arith.constant 0 : index
    %c0_11 = arith.constant 0 : index
    %32 = vector.load %arg4[%c0_10, %c0_11] : memref<8x256xf32, #tpu.memory_space<vmem>>, vector<8x256xf32>
    tpu.vector_store %arg4[%c0_10, %c0_11], %31 {strides = array<i32>} : memref<8x256xf32, #tpu.memory_space<vmem>>, vector<8x256xf32>,
    %c0_12 = arith.constant 0 : index
    %c0_13 = arith.constant 0 : index
    %33 = vector.load %arg5[%c0_12, %c0_13] : memref<8x256xf32, #tpu.memory_space<vmem>>, vector<8x256xf32>
    %34 = vector.shape_cast %27 : vector<8x256xf32> to vector<1x8x256xf32>
    %cst_14 = arith.constant dense<0.000000e+00> : vector<8x256xf32>
    %35 = vector.multi_reduction <add>, %34, %cst_14 [0] : vector<1x8x256xf32> to vector<8x256xf32>
    %36 = arith.addf %33, %35 : vector<8x256xf32>
    %c0_15 = arith.constant 0 : index
    %c0_16 = arith.constant 0 : index
    %37 = vector.load %arg5[%c0_15, %c0_16] : memref<8x256xf32, #tpu.memory_space<vmem>>, vector<8x256xf32>
    tpu.vector_store %arg5[%c0_15, %c0_16], %36 {strides = array<i32>} : memref<8x256xf32, #tpu.memory_space<vmem>>, vector<8x256xf32>,
    %c0_17 = arith.constant 0 : index
    %c0_18 = arith.constant 0 : index
    %38 = vector.load %arg6[%c0_17, %c0_18] : memref<8x256xf32, #tpu.memory_space<vmem>>, vector<8x256xf32>
    %39 = vector.shape_cast %10 : vector<8x256xf32> to vector<1x8x256xf32>
    %cst_19 = arith.constant dense<0.000000e+00> : vector<8x256xf32>
    %40 = vector.multi_reduction <add>, %39, %cst_19 [0] : vector<1x8x256xf32> to vector<8x256xf32>
    %41 = arith.addf %38, %40 : vector<8x256xf32>
    %c0_20 = arith.constant 0 : index
    %c0_21 = arith.constant 0 : index
    %42 = vector.load %arg6[%c0_20, %c0_21] : memref<8x256xf32, #tpu.memory_space<vmem>>, vector<8x256xf32>
    tpu.vector_store %arg6[%c0_20, %c0_21], %41 {strides = array<i32>} : memref<8x256xf32, #tpu.memory_space<vmem>>, vector<8x256xf32>,
    return
  }
  func.func @transform_0(%arg0: i32, %arg1: i32) -> (i32, i32) {
    %c1_i32 = arith.constant 1 : i32
    %0 = arith.muli %arg0, %c1_i32 : i32
    %1 = arith.addi %0, %arg1 : i32
    %c0_i32 = arith.constant 0 : i32
    %c0_i32_0 = arith.constant 0 : i32
    return %1, %c0_i32 : i32, i32
  }
  func.func @transform_1(%arg0: i32, %arg1: i32) -> (i32, i32) {
    %c1_i32 = arith.constant 1 : i32
    %0 = arith.muli %arg0, %c1_i32 : i32
    %1 = arith.addi %0, %arg1 : i32
    %c0_i32 = arith.constant 0 : i32
    %c0_i32_0 = arith.constant 0 : i32
    return %1, %c0_i32 : i32, i32
  }
  func.func @transform_2(%arg0: i32, %arg1: i32) -> (i32, i32) {
    %c0_i32 = arith.constant 0 : i32
    %c0_i32_0 = arith.constant 0 : i32
    return %arg0, %c0_i32 : i32, i32
  }
  func.func @transform_3(%arg0: i32, %arg1: i32) -> (i32, i32) {
    %c0_i32 = arith.constant 0 : i32
    %c0_i32_0 = arith.constant 0 : i32
    return %arg0, %c0_i32 : i32, i32
  }
  func.func @transform_4(%arg0: i32, %arg1: i32) -> (i32, i32) {
    %c0_i32 = arith.constant 0 : i32
    %c0_i32_0 = arith.constant 0 : i32
    return %arg0, %c0_i32 : i32, i32
  }
}

</mosaic_0001>

<bundles_post_ra>
// kernel: tpu_custom_call.1
= control target key start
LH: loop header
LB: loop body
LE: loop exit
PB: predicated region body
PF: predicated region fallthrough
CT: control target
= control target key end

     0   :  { %10 = vsyncpa [#allocation3], 0  ;;  %s414_s0 = inlined_call_operand.hbm [shape: f32[8,256], index: 0, kind: input, shape index: {}]   ;;  %s415_s1 = inlined_call_operand.hbm [shape: f32[8,256], index: 1, kind: input, shape index: {}]   ;;  %s416_s2 = inlined_call_operand.hbm [shape: f32[8,256], index: 2, kind: output, shape index: {0}]   ;;  %s417_s3 = inlined_call_operand.hbm [shape: f32[8,256], index: 3, kind: output, shape index: {1}]   ;;  %s418_s4 = inlined_call_operand.hbm [shape: f32[8,256], index: 4, kind: output, shape index: {2}]  }
   0x1   :  { %11 = vsyncpa [#allocation6], 0 }
   0x2   :  { %12 = vsyncpa [#allocation4], 0 }
   0x3   :  { %13 = vsyncpa [#allocation9], 0  ;;  %s309_s15 = smov [#allocation2]   ;;  %s310_s17 = smov [#allocation5]  }
   0x4   :  { %s24_s16 = sshll.u32 %s309_s15, 4  ;;  %s38_s18 = sshll.u32 %s310_s17, 4  ;;  %s25_s16 = int_to_ptr.vmem [resolvable:$true] %s24_s16  ;;  %s39_s18 = int_to_ptr.vmem [resolvable:$true] %s38_s18 }
   0x5   :  { %s191_s21 = scalar_lea.hbm %s414_s0, 256 }
   0x6   :  { %p192_p0 = scmp.ne.s32.totalorder %s414_s0, %s191_s21  ;;  %p195_p1 = scmp.lt.u32.totalorder %s191_s21, %s414_s0 }
   0x8   :  { %p197_p2 = pnand %p195_p1, %p192_p0 }
   0xa   :  { %200 = shalt.err (!%p197_p2)
}
   0xb   :  { %s201_s26 = scalar_lea.vmem %s25_s16, 256  ;;  %p206_p4 = scmp.lt.s32.totalorder %s25_s16, %s25_s16 }
   0xc   :  { %p202_p3 = scmp.ne.s32.totalorder %s25_s16, %s201_s26  ;;  %p207_p5 = scmp.lt.s32.totalorder %s201_s26, %s201_s26 }
   0xe   :  { %p208_p6 = por %p207_p5, %p206_p4 }
  0x10   :  { %p209_p7 = pnand %p208_p6, %p202_p3 }
  0x12   :  { %212 = shalt.err (!%p209_p7)
}
  0x13   :  { %27 = dma.hbm_to_vmem [thread:$0]  %s414_s0, 256, %s25_s16, [#allocation3]  }
  0x14   :  { %s213_s5 = scalar_lea.hbm %s415_s1, 256 }
  0x15   :  { %p214_p8 = scmp.ne.s32.totalorder %s415_s1, %s213_s5  ;;  %p217_p9 = scmp.lt.u32.totalorder %s213_s5, %s415_s1 }
  0x17   :  { %p219_p10 = pnand %p217_p9, %p214_p8 }
  0x19   :  { %222 = shalt.err (!%p219_p10)
}
  0x1a   :  { %s223_s10 = scalar_lea.vmem %s39_s18, 256  ;;  %p228_p12 = scmp.lt.s32.totalorder %s39_s18, %s39_s18 }
  0x1b   :  { %p224_p11 = scmp.ne.s32.totalorder %s39_s18, %s223_s10  ;;  %p229_p13 = scmp.lt.s32.totalorder %s223_s10, %s223_s10 }
  0x1d   :  { %p230_p0 = por %p229_p13, %p228_p12 }
  0x1f   :  { %p231_p1 = pnand %p230_p0, %p224_p11 }
  0x21   :  { %234 = shalt.err (!%p231_p1)
}
  0x22   :  { %41 = dma.hbm_to_vmem [thread:$0]  %s415_s1, 256, %s39_s18, [#allocation6]  }
  0x23   :  { %301 = dma.done.wait [#allocation3], 256  }
  0x24   :  { %302 = vsyncadd [#allocation3], 4294967040 }
  0x25   :  { %303 = dma.done.wait [#allocation6], 256  }
  0x26   :  { %304 = vsyncadd [#allocation6], 4294967040  ;;  %v60_v0 = vld [vmem:[#allocation2] sm:$0xff]  ;;  %v61_v1 = vld [vmem:[#allocation2 + $0x8] sm:$0xff]  ;;  %v311_v7 = vmov 0.0   ;;  %s312_s1 = smov [#allocation8]  }
  0x27   :  { %v64_v2 = vsub.f32 1.0, %v60_v0  ;;  %v65_v3 = vsub.f32 1.0, %v61_v1  ;;  %v62_v4 = vld [vmem:[#allocation5] sm:$0xff]  ;;  %v63_v5 = vld [vmem:[#allocation5 + $0x8] sm:$0xff]  ;;  %v98_v13 = vmul.f32 %v60_v0, %v60_v0  ;;  %v99_v15 = vmul.f32 %v61_v1, %v61_v1  ;;  %s146_s12 = sshll.u32 %s312_s1, 4  ;;  %s313_s13 = smov [#allocation7]   ;;  %s147_s12 = int_to_ptr.vmem [resolvable:$true] %s146_s12 }
  0x28   :  { %vm66_vm0 = vcmp.eq.f32.partialorder %v62_v4, 1.0  ;;  %vm67_vm1 = vcmp.eq.f32.partialorder %v63_v5, 1.0  ;;  %v78_v6 = vsub.f32 1.0, %v62_v4  ;;  %v79_v10 = vsub.f32 1.0, %v63_v5  ;;  %s136_s14 = sshll.u32 %s313_s13, 4  ;;  %s314_s15 = smov [#allocation10]   ;;  %s364_s14 = int_to_ptr.vmem [resolvable:$true] %s136_s14 }
  0x29   :  { %183 = vlog2.f32 %v64_v2  ;;  %v173_v8 = vsel %vm66_vm0, 1.0, %v311_v7  ;;  %v174_v9 = vsel %vm67_vm1, 1.0, %v311_v7  ;;  %vm72_vm2 = vcmp.lt.f32.partialorder %v62_v4, 1.0  ;;  %s156_s16 = sshll.u32 %s314_s15, 4  ;;  %s235_s17 = scalar_lea.vmem %s147_s12, 256  ;;  %s366_s16 = int_to_ptr.vmem [resolvable:$true] %s156_s16 }
  0x2a   :  { %185 = vlog2.f32 %v65_v3  ;;  %128 = vst [vmem:[#allocation10] sm:$0xff] %v173_v8  ;;  %129 = vst [vmem:[#allocation10 + $0x8] sm:$0xff] %v174_v9  ;;  %v80_v11 = vmul.f32 %v78_v6, %v78_v6  ;;  %v81_v12 = vmul.f32 %v79_v10, %v79_v10  ;;  %v88_v19 = vmul.f32 %v64_v2, %v64_v2  ;;  %p236_p2 = scmp.ne.s32.totalorder %s147_s12, %s235_s17  ;;  %p240_p3 = scmp.lt.s32.totalorder %s147_s12, %s147_s12 }
  0x2b   :  { %187 = vlog2.f32 %v60_v0  ;;  %vm73_vm3 = vcmp.lt.f32.partialorder %v63_v5, 1.0  ;;  %v89_v23 = vmul.f32 %v65_v3, %v65_v3  ;;  %v175_v27 = vsel %vm72_vm2, 1.0, %v311_v7  ;;  %p241_p4 = scmp.lt.s32.totalorder %s235_s17, %s235_s17 }
  0x2c   :  { %189 = vlog2.f32 %v61_v1  ;;  %v82_v17 = vmul.f32 %v80_v11, %v80_v11  ;;  %v83_v21 = vmul.f32 %v81_v12, %v81_v12  ;;  %v176_v31 = vsel %vm73_vm3, 1.0, %v311_v7 }
  0x2d   :  { %p242_p5 = por %p241_p4, %p240_p3 }
  0x2f   :  { %p243_p6 = pnand %p242_p5, %p236_p2 }
  0x33   :  { %v184_v14 = vpop.eup %183 }
  0x34   :  { %v186_v16 = vpop.eup %185  ;;  %v95_v18 = vmul.f32 0.6931472, %v184_v14 }
  0x35   :  { %v188_v20 = vpop.eup %187  ;;  %v97_v22 = vmul.f32 0.6931472, %v186_v16 }
  0x36   :  { %v190_v24 = vpop.eup %189  ;;  %v100_v25 = vmul.f32 %v98_v13, %v95_v18  ;;  %v85_v26 = vmul.f32 0.6931472, %v188_v20 }
  0x37   :  { %v101_v28 = vmul.f32 %v99_v15, %v97_v22  ;;  %v87_v29 = vmul.f32 0.6931472, %v190_v24 }
  0x38   :  { %v102_v30 = vmul.f32 %v100_v25, %v82_v17  ;;  %v90_v32 = vmul.f32 %v88_v19, %v85_v26 }
  0x39   :  { %v103_v33 = vmul.f32 %v101_v28, %v83_v21  ;;  %v91_v34 = vmul.f32 %v89_v23, %v87_v29 }
  0x3a   :  { %v104_v35 = vmul.f32 %v175_v27, %v102_v30  ;;  %v92_v36 = vmul.f32 %v173_v8, %v90_v32 }
  0x3b   :  { %v105_v37 = vmul.f32 %v176_v31, %v103_v33  ;;  %v93_v38 = vmul.f32 %v174_v9, %v91_v34 }
  0x3c   :  { %120 = vst [vmem:[#allocation8] sm:$0xff] %v104_v35  ;;  %112 = vst [vmem:[#allocation7] sm:$0xff] %v92_v36 }
  0x3d   :  { %121 = vst [vmem:[#allocation8 + $0x8] sm:$0xff] %v105_v37  ;;  %113 = vst [vmem:[#allocation7 + $0x8] sm:$0xff] %v93_v38 }
  0x3e   :  { %246 = shalt.err (!%p243_p6)
}
  0x3f   :  { %s247_s20 = scalar_lea.hbm %s417_s3, 256 }
  0x40   :  { %p248_p7 = scmp.ne.s32.totalorder %s417_s3, %s247_s20  ;;  %p251_p8 = scmp.lt.u32.totalorder %s247_s20, %s417_s3 }
  0x42   :  { %p253_p9 = pnand %p251_p8, %p248_p7 }
  0x44   :  { %256 = shalt.err (!%p253_p9)
}
  0x45   :  { %149 = dma.vmem_to_hbm [thread:$0]  %s147_s12, 256, %s417_s3, [#allocation9]  }
  0x46   :  { %s257_s27 = scalar_lea.vmem %s364_s14, 256  ;;  %p262_p11 = scmp.lt.s32.totalorder %s364_s14, %s364_s14 }
  0x47   :  { %p258_p10 = scmp.ne.s32.totalorder %s364_s14, %s257_s27  ;;  %p263_p12 = scmp.lt.s32.totalorder %s257_s27, %s257_s27 }
  0x49   :  { %p264_p13 = por %p263_p12, %p262_p11 }
  0x4b   :  { %p265_p0 = pnand %p264_p13, %p258_p10 }
  0x4d   :  { %268 = shalt.err (!%p265_p0)
}
  0x4e   :  { %s269_s30 = scalar_lea.hbm %s416_s2, 256 }
  0x4f   :  { %p270_p1 = scmp.ne.s32.totalorder %s416_s2, %s269_s30  ;;  %p273_p2 = scmp.lt.u32.totalorder %s269_s30, %s416_s2 }
  0x51   :  { %p275_p3 = pnand %p273_p2, %p270_p1 }
  0x53   :  { %278 = shalt.err (!%p275_p3)
}
  0x54   :  { %139 = dma.vmem_to_hbm [thread:$0]  %s364_s14, 256, %s416_s2, [#allocation4]  }
  0x55   :  { %s279_s10 = scalar_lea.vmem %s366_s16, 256  ;;  %p284_p5 = scmp.lt.s32.totalorder %s366_s16, %s366_s16 }
  0x56   :  { %p280_p4 = scmp.ne.s32.totalorder %s366_s16, %s279_s10  ;;  %p285_p6 = scmp.lt.s32.totalorder %s279_s10, %s279_s10 }
  0x58   :  { %p286_p7 = por %p285_p6, %p284_p5 }
  0x5a   :  { %p287_p8 = pnand %p286_p7, %p280_p4 }
  0x5c   :  { %290 = shalt.err (!%p287_p8)
}
  0x5d   :  { %s291_s1 = scalar_lea.hbm %s418_s4, 256 }
  0x5e   :  { %p292_p9 = scmp.ne.s32.totalorder %s418_s4, %s291_s1  ;;  %p295_p10 = scmp.lt.u32.totalorder %s291_s1, %s418_s4 }
  0x60   :  { %p297_p11 = pnand %p295_p10, %p292_p9 }
  0x62   :  { %300 = shalt.err (!%p297_p11)
}
  0x63   :  { %159 = dma.vmem_to_hbm [thread:$0]  %s366_s16, 256, %s418_s4, [#allocation9]  }
  0x64   :  { %305 = dma.done.wait [#allocation4], 256  }
  0x65   :  { %306 = vsyncadd [#allocation4], 4294967040 }
  0x66   :  { %307 = dma.done.wait [#allocation9], 512  }
  0x67   :  { %308 = vsyncadd [#allocation9], 4294966784 }
  0x68   :  { %169 = vsyncpa [#allocation3], 1 }
  0x69   :  { %170 = vsyncpa [#allocation6], 1 }
  0x6a   :  { %171 = vsyncpa [#allocation4], 1 }
  0x6b   :  { %172 = vsyncpa [#allocation9], 1 }

</bundles_post_ra>
